<compile_context>
chip_gen: v7x
topology: tpu7x:2x2x1
jax: 0.10.0
libtpu: 0.0.40
codegen_flags: <defaults>
</compile_context>

<pallas_src>
import jax
import jax.numpy as jnp
from jax.experimental import pallas as pl
from jax.experimental.pallas import tpu as pltpu


_VMEM_CAP = 40 << 20             # scoped-VMEM cap; headroom on v7x's 64 MiB/TC
_PATH_A_VMEM_BUDGET = 28 << 20   # above this, use the K-tiled two-pass path
_SMALL_VMEM = 8 << 20            # below this, collapse the grid to one step


def _round_up(x, m):
    return ((x + m - 1) // m) * m


def _path_a_vmem_bytes(tile_b, tile_n, num_items, hidden):
    """Rough double-buffered VMEM footprint of the fused single-kernel path."""
    return (2 * tile_b * num_items * 4      # x tile (f32, cast in-kernel)
            + 2 * num_items * hidden * 2    # W1 (bf16, resident)
            + 2 * hidden * 4                # b1
            + 2 * hidden * tile_n * 2       # W_dec tile (bf16)
            + 2 * tile_n * 4                # b_dec tile
            + 2 * tile_b * tile_n * 4       # out tile (f32)
            + tile_b * hidden * 2)          # h scratch (bf16)


# --------------------------------------------------------------------------
# Kernels
# --------------------------------------------------------------------------
def _ae_fused_kernel(x_ref, w1_ref, b1_ref, wdec_ref, bdec_ref, out_ref, h_sc):
    # Encoder (Linear + Tanh) runs once per batch tile (n == 0) and is cached
    # in VMEM scratch (bf16) for reuse by every output-column tile.
    # NOTE: correctness relies on grid axis 1 being the sequential innermost
    # axis; it must stay "arbitrary" (never "parallel").
    @pl.when(pl.program_id(1) == 0)
    def _():
        xb = x_ref[...].astype(jnp.bfloat16)          # in-kernel cast
        h = jnp.dot(xb, w1_ref[...],
                    preferred_element_type=jnp.float32) + b1_ref[...]
        h_sc[...] = jnp.tanh(h).astype(h_sc.dtype)

    # Fused latent+decoder: one hidden -> num_items matmul (f32 accumulate).
    out = jnp.dot(h_sc[...], wdec_ref[...],
                  preferred_element_type=jnp.float32) + bdec_ref[...]
    out_ref[...] = out.astype(out_ref.dtype)


def _encoder_kernel(x_ref, w1_ref, b1_ref, h_ref, acc_sc):
    # K-tiled encoder: accumulate x(k) @ W1(k) in f32, finalize on last k.
    k = pl.program_id(1)

    @pl.when(k == 0)
    def _():
        acc_sc[...] = jnp.zeros_like(acc_sc)

    acc_sc[...] += jnp.dot(x_ref[...].astype(jnp.bfloat16), w1_ref[...],
                           preferred_element_type=jnp.float32)

    @pl.when(k == pl.num_programs(1) - 1)
    def _():
        h_ref[...] = jnp.tanh(acc_sc[...] + b1_ref[...]).astype(h_ref.dtype)


def _decoder_kernel(h_ref, wdec_ref, bdec_ref, out_ref):
    out = jnp.dot(h_ref[...], wdec_ref[...],
                  preferred_element_type=jnp.float32) + bdec_ref[...]
    out_ref[...] = out.astype(out_ref.dtype)


# --------------------------------------------------------------------------
# Parameter preparation (done ONCE, outside the per-call forward)
# --------------------------------------------------------------------------
def fuse_decoder(params):
    """Fold latent + decoder linears into one hidden->num_items affine map and
    pre-cast the MXU weight operands to bf16."""
    wl, bl = params["wl"], params["bl"]
    w2, b2 = params["w2"], params["b2"]
    w3, b3 = params["w3"], params["b3"]
    w_dec = wl @ w2 @ w3                          # [hidden, num_items], f32
    b_dec = bl @ w2 @ w3 + b2 @ w3 + b3           # [1, num_items], f32
    return {
        "w1_bf16": params["w1"].astype(jnp.bfloat16),   # [num_items, hidden]
        "b1": params["b1"],                             # [1, hidden] f32
        "w_dec_bf16": w_dec.astype(jnp.bfloat16),       # [hidden, num_items]
        "b_dec": b_dec,                                  # [1, num_items] f32
    }


# --------------------------------------------------------------------------
# Forward
# --------------------------------------------------------------------------
def ae_forward(x, fused, *, tile_b=256, tile_n=512, tile_k=2048,
               out_dtype=jnp.float32, force_two_pass=False):
    """x: [B, num_items] f32.  fused: output of fuse_decoder()."""
    B, num_items = x.shape
    w1 = fused["w1_bf16"]
    b1 = fused["b1"]
    w_dec = fused["w_dec_bf16"]
    b_dec = fused["b_dec"]
    hidden = w1.shape[1]

    Bp16 = _round_up(B, 16)              # bf16 packs 16 rows per sublane tile
    Np128 = _round_up(num_items, 128)

    # ---- tile selection ----------------------------------------------------
    if (not force_two_pass and
            _path_a_vmem_bytes(Bp16, Np128, num_items, hidden) <= _SMALL_VMEM):
        # Small problem (e.g. the demo): collapse the grid entirely.
        tile_b, tile_n = Bp16, Np128
        use_two_pass = False
    else:
        tile_b = max(16, min(_round_up(tile_b, 16), Bp16))
        tile_n = max(128, min(_round_up(tile_n, 128), Np128))
        use_two_pass = force_two_pass or (
            _path_a_vmem_bytes(tile_b, tile_n, num_items, hidden)
            > _PATH_A_VMEM_BUDGET)

    Bp = _round_up(B, tile_b)
    Np = _round_up(num_items, tile_n)

    xp = x if Bp == B else jnp.pad(x, ((0, Bp - B), (0, 0)))          # stays f32
    wdp = w_dec if Np == num_items else jnp.pad(w_dec, ((0, 0), (0, Np - num_items)))
    bdp = b_dec if Np == num_items else jnp.pad(b_dec, ((0, 0), (0, Np - num_items)))

    dim_sem = ("parallel", "arbitrary")

    if not use_two_pass:
        # ---- Path A: fused single kernel, W1 resident in VMEM --------------
        vmem_bytes = _path_a_vmem_bytes(tile_b, tile_n, num_items, hidden)
        out = pl.pallas_call(
            _ae_fused_kernel,
            out_shape=jax.ShapeDtypeStruct((Bp, Np), out_dtype),
            grid_spec=pltpu.PrefetchScalarGridSpec(
                num_scalar_prefetch=0,
                grid=(Bp // tile_b, Np // tile_n),
                in_specs=[
                    pl.BlockSpec((tile_b, num_items), lambda i, n: (i, 0)),  # x (f32)
                    pl.BlockSpec((num_items, hidden), lambda i, n: (0, 0)),  # W1 (bf16)
                    pl.BlockSpec((1, hidden),         lambda i, n: (0, 0)),  # b1 (f32)
                    pl.BlockSpec((hidden, tile_n),    lambda i, n: (0, n)),  # W_dec tile
                    pl.BlockSpec((1, tile_n),         lambda i, n: (0, n)),  # b_dec tile
                ],
                out_specs=pl.BlockSpec((tile_b, tile_n), lambda i, n: (i, n)),
                scratch_shapes=[pltpu.VMEM((tile_b, hidden), jnp.bfloat16)],
            ),
            compiler_params=pltpu.CompilerParams(
                dimension_semantics=dim_sem,
                vmem_limit_bytes=min(int(vmem_bytes * 1.5) + (2 << 20), _VMEM_CAP)),
            cost_estimate=pl.CostEstimate(
                flops=4 * Bp * num_items * hidden,
                transcendentals=Bp * hidden,
                bytes_accessed=(xp.size * 4 + w1.size * 2 + wdp.size * 2
                                + b1.size * 4 + bdp.size * 4 + Bp * Np * 4)),
        )(xp, w1, b1, wdp, bdp)
        return out[:B, :num_items]

    # ---- Path B: K-tiled encoder + streaming decoder (large num_items) -----
    tile_k = max(128, min(_round_up(tile_k, 128), Np128))
    Kp = _round_up(num_items, tile_k)
    xk = xp if Kp == num_items else jnp.pad(xp, ((0, 0), (0, Kp - num_items)))
    w1k = w1 if Kp == num_items else jnp.pad(w1, ((0, Kp - num_items), (0, 0)))

    enc_vmem = (2 * tile_b * tile_k * 4 + 2 * tile_k * hidden * 2
                + 2 * hidden * 4 + 2 * tile_b * hidden * 2
                + tile_b * hidden * 4)
    h = pl.pallas_call(
        _encoder_kernel,
        out_shape=jax.ShapeDtypeStruct((Bp, hidden), jnp.bfloat16),
        grid_spec=pltpu.PrefetchScalarGridSpec(
            num_scalar_prefetch=0,
            grid=(Bp // tile_b, Kp // tile_k),
            in_specs=[
                pl.BlockSpec((tile_b, tile_k), lambda i, k: (i, k)),   # x tile (f32)
                pl.BlockSpec((tile_k, hidden), lambda i, k: (k, 0)),   # W1 K-tile
                pl.BlockSpec((1, hidden),      lambda i, k: (0, 0)),   # b1
            ],
            out_specs=pl.BlockSpec((tile_b, hidden), lambda i, k: (i, 0)),
            scratch_shapes=[pltpu.VMEM((tile_b, hidden), jnp.float32)],
        ),
        compiler_params=pltpu.CompilerParams(
            dimension_semantics=dim_sem,
            vmem_limit_bytes=min(int(enc_vmem * 1.5) + (2 << 20), _VMEM_CAP)),
        cost_estimate=pl.CostEstimate(
            flops=2 * Bp * Kp * hidden,
            transcendentals=Bp * hidden,
            bytes_accessed=xk.size * 4 + w1k.size * 2 + Bp * hidden * 2),
    )(xk, w1k, b1)

    dec_vmem = (2 * tile_b * hidden * 2 + 2 * hidden * tile_n * 2
                + 2 * tile_n * 4 + 2 * tile_b * tile_n * 4)
    out = pl.pallas_call(
        _decoder_kernel,
        out_shape=jax.ShapeDtypeStruct((Bp, Np), out_dtype),
        grid_spec=pltpu.PrefetchScalarGridSpec(
            num_scalar_prefetch=0,
            grid=(Bp // tile_b, Np // tile_n),
            in_specs=[
                pl.BlockSpec((tile_b, hidden), lambda i, n: (i, 0)),   # h (bf16)
                pl.BlockSpec((hidden, tile_n), lambda i, n: (0, n)),   # W_dec tile
                pl.BlockSpec((1, tile_n),      lambda i, n: (0, n)),   # b_dec tile
            ],
            out_specs=pl.BlockSpec((tile_b, tile_n), lambda i, n: (i, n)),
        ),
        compiler_params=pltpu.CompilerParams(
            dimension_semantics=dim_sem,
            vmem_limit_bytes=min(int(dec_vmem * 1.5) + (2 << 20), _VMEM_CAP)),
        cost_estimate=pl.CostEstimate(
            flops=2 * Bp * hidden * Np,
            transcendentals=0,
            bytes_accessed=Bp * hidden * 2 + wdp.size * 2 + Bp * Np * 4),
    )(h, wdp, bdp)
    return out[:B, :num_items]


# --------------------------------------------------------------------------
# Init + reference
# --------------------------------------------------------------------------
def xavier_uniform(key, fan_in, fan_out):
    limit = (6.0 / (fan_in + fan_out)) ** 0.5
    return jax.random.uniform(key, (fan_in, fan_out), jnp.float32, -limit, limit)


def init_params(key, num_items, hidden, latent):
    ks = jax.random.split(key, 8)
    return {
        "w1": xavier_uniform(ks[0], num_items, hidden),
        "b1": jax.random.uniform(ks[1], (1, hidden), jnp.float32),
        "wl": xavier_uniform(ks[2], hidden, latent),
        "bl": jax.random.uniform(ks[3], (1, latent), jnp.float32),
        "w2": xavier_uniform(ks[4], latent, hidden),
        "b2": jax.random.uniform(ks[5], (1, hidden), jnp.float32),
        "w3": xavier_uniform(ks[6], hidden, num_items),
        "b3": jax.random.uniform(ks[7], (1, num_items), jnp.float32),
    }


def ae_reference(x, p):
    # Faithful f32 4-linear reference (matches the PyTorch module's forward).
    h = jnp.tanh(x @ p["w1"] + p["b1"])
    z = h @ p["wl"] + p["bl"]
    d = z @ p["w2"] + p["b2"]
    return d @ p["w3"] + p["b3"]


if __name__ == "__main__":
    # Module-consistent small shapes: AE(num_items=256, latent_dim=64, hidden_layers=[128])
    B, NUM_ITEMS, HIDDEN, LATENT = 256, 256, 128, 64

    key = jax.random.PRNGKey(0)
    k_x, k_p = jax.random.split(key)

    x = jax.random.normal(k_x, (B, NUM_ITEMS), jnp.float32)
    params = init_params(k_p, NUM_ITEMS, HIDDEN, LATENT)
    fused = fuse_decoder(params)          # once, at "parameter load" time

    ref = ae_reference(x, params)

    # Path A: fused single kernel; grid collapses to one step at these sizes.
    out = jax.block_until_ready(ae_forward(x, fused))
    assert out.shape == (B, NUM_ITEMS)
    assert jnp.allclose(out, ref, atol=3e-2, rtol=3e-2), "path A mismatch vs reference"

    # Path B: exercise the K-tiled two-pass path (used for large num_items)
    # on the same small shapes by forcing it with small tiles.
    out2 = jax.block_until_ready(
        ae_forward(x, fused, force_two_pass=True, tile_b=128, tile_n=128, tile_k=128))
    assert out2.shape == (B, NUM_ITEMS)
    assert jnp.allclose(out2, ref, atol=3e-2, rtol=3e-2), "path B mismatch vs reference"

    print("KERNEL_OK")
</pallas_src>

<mosaic_0001>
module attributes {stable_mosaic.version = 11 : i64} {
  func.func @_ae_fused_kernel(%arg0: i32, %arg1: i32, %arg2: memref<256x256xf32, #tpu.memory_space<vmem>>, %arg3: memref<256x128xbf16, #tpu.memory_space<vmem>>, %arg4: memref<1x128xf32, #tpu.memory_space<vmem>>, %arg5: memref<128x256xbf16, #tpu.memory_space<vmem>>, %arg6: memref<1x256xf32, #tpu.memory_space<vmem>>, %arg7: memref<256x256xf32, #tpu.memory_space<vmem>>, %arg8: memref<256x128xbf16, #tpu.memory_space<vmem>>) attributes {dimension_semantics = [#tpu.dimension_semantics<parallel>, #tpu.dimension_semantics<arbitrary>], iteration_bounds = array<i64: 1, 1>, scalar_prefetch = 0 : i64, scratch_operands = 1 : i64, tpu.core_type = #tpu.core_type<tc>, window_params = [{transform_indices = @transform_0, window_bounds = array<i64: 256, 256>}, {pipeline_mode = #tpu.pipeline_mode<synchronous>, transform_indices = @transform_1, window_bounds = array<i64: 256, 128>}, {pipeline_mode = #tpu.pipeline_mode<synchronous>, transform_indices = @transform_2, window_bounds = array<i64: 1, 128>}, {transform_indices = @transform_3, window_bounds = array<i64: 128, 256>}, {transform_indices = @transform_4, window_bounds = array<i64: 1, 256>}, {transform_indices = @transform_5, window_bounds = array<i64: 256, 256>}]} {
    %c0_i32 = arith.constant 0 : i32
    %0 = arith.cmpi eq, %arg1, %c0_i32 : i32
    %1 = arith.extui %0 : i1 to i32
    %c0_i32_0 = arith.constant 0 : i32
    %2 = arith.cmpi ne, %1, %c0_i32_0 : i32
    scf.if %2 {
      %c0_8 = arith.constant 0 : index
      %c0_9 = arith.constant 0 : index
      %10 = vector.load %arg2[%c0_8, %c0_9] : memref<256x256xf32, #tpu.memory_space<vmem>>, vector<256x256xf32>
      %11 = arith.truncf %10 : vector<256x256xf32> to vector<256x256xbf16>
      %c0_10 = arith.constant 0 : index
      %c0_11 = arith.constant 0 : index
      %12 = vector.load %arg3[%c0_10, %c0_11] : memref<256x128xbf16, #tpu.memory_space<vmem>>, vector<256x128xbf16>
      %cst_12 = arith.constant dense<0.000000e+00> : vector<256x128xf32>
      %13 = tpu.matmul %11, %12, %cst_12 {dimension_numbers = #tpu.dot_dimension_numbers<[1], [0], [0], [1], [0, 0, 1, 1], [], []>} : vector<256x256xbf16>, vector<256x128xbf16>, vector<256x128xf32> -> vector<256x128xf32>
      %c0_13 = arith.constant 0 : index
      %c0_14 = arith.constant 0 : index
      %14 = vector.load %arg4[%c0_13, %c0_14] : memref<1x128xf32, #tpu.memory_space<vmem>>, vector<1x128xf32>
      %15 = vector.broadcast %14 : vector<1x128xf32> to vector<256x128xf32>
      %16 = arith.addf %13, %15 : vector<256x128xf32>
      %17 = math.tanh %16 : vector<256x128xf32>
      %18 = arith.truncf %17 : vector<256x128xf32> to vector<256x128xbf16>
      %c0_15 = arith.constant 0 : index
      %c0_16 = arith.constant 0 : index
      %19 = vector.load %arg8[%c0_15, %c0_16] : memref<256x128xbf16, #tpu.memory_space<vmem>>, vector<256x128xbf16>
      tpu.vector_store %arg8[%c0_15, %c0_16], %18 {strides = array<i32>} : memref<256x128xbf16, #tpu.memory_space<vmem>>, vector<256x128xbf16>,
    } else {
    }
    %c0 = arith.constant 0 : index
    %c0_1 = arith.constant 0 : index
    %3 = vector.load %arg8[%c0, %c0_1] : memref<256x128xbf16, #tpu.memory_space<vmem>>, vector<256x128xbf16>
    %c0_2 = arith.constant 0 : index
    %c0_3 = arith.constant 0 : index
    %4 = vector.load %arg5[%c0_2, %c0_3] : memref<128x256xbf16, #tpu.memory_space<vmem>>, vector<128x256xbf16>
    %cst = arith.constant dense<0.000000e+00> : vector<256x256xf32>
    %5 = tpu.matmul %3, %4, %cst {dimension_numbers = #tpu.dot_dimension_numbers<[1], [0], [0], [1], [0, 0, 1, 1], [], []>} : vector<256x128xbf16>, vector<128x256xbf16>, vector<256x256xf32> -> vector<256x256xf32>
    %c0_4 = arith.constant 0 : index
    %c0_5 = arith.constant 0 : index
    %6 = vector.load %arg6[%c0_4, %c0_5] : memref<1x256xf32, #tpu.memory_space<vmem>>, vector<1x256xf32>
    %7 = vector.broadcast %6 : vector<1x256xf32> to vector<256x256xf32>
    %8 = arith.addf %5, %7 : vector<256x256xf32>
    %c0_6 = arith.constant 0 : index
    %c0_7 = arith.constant 0 : index
    %9 = vector.load %arg7[%c0_6, %c0_7] : memref<256x256xf32, #tpu.memory_space<vmem>>, vector<256x256xf32>
    tpu.vector_store %arg7[%c0_6, %c0_7], %8 {strides = array<i32>} : memref<256x256xf32, #tpu.memory_space<vmem>>, vector<256x256xf32>,
    return
  }
  func.func @transform_0(%arg0: i32, %arg1: i32) -> (i32, i32) {
    %c0_i32 = arith.constant 0 : i32
    %c0_i32_0 = arith.constant 0 : i32
    return %arg0, %c0_i32 : i32, i32
  }
  func.func @transform_1(%arg0: i32, %arg1: i32) -> (i32, i32) {
    %c0_i32 = arith.constant 0 : i32
    %c0_i32_0 = arith.constant 0 : i32
    %c0_i32_1 = arith.constant 0 : i32
    return %c0_i32, %c0_i32_0 : i32, i32
  }
  func.func @transform_2(%arg0: i32, %arg1: i32) -> (i32, i32) {
    %c0_i32 = arith.constant 0 : i32
    %c0_i32_0 = arith.constant 0 : i32
    %c0_i32_1 = arith.constant 0 : i32
    return %c0_i32, %c0_i32_0 : i32, i32
  }
  func.func @transform_3(%arg0: i32, %arg1: i32) -> (i32, i32) {
    %c0_i32 = arith.constant 0 : i32
    %c0_i32_0 = arith.constant 0 : i32
    return %c0_i32, %arg1 : i32, i32
  }
  func.func @transform_4(%arg0: i32, %arg1: i32) -> (i32, i32) {
    %c0_i32 = arith.constant 0 : i32
    %c0_i32_0 = arith.constant 0 : i32
    return %c0_i32, %arg1 : i32, i32
  }
  func.func @transform_5(%arg0: i32, %arg1: i32) -> (i32, i32) {
    %c0_i32 = arith.constant 0 : i32
    return %arg0, %arg1 : i32, i32
  }
}

</mosaic_0001>

<bundles_post_ra>
// kernel: tpu_custom_call.1
= control target key start
LH: loop header
LB: loop body
LE: loop exit
PB: predicated region body
PF: predicated region fallthrough
CT: control target
= control target key end

     0   :  { %10 = vsyncpa [#allocation4], 0  ;;  %s1495_s0 = inlined_call_operand.hbm [shape: f32[256,256], index: 0, kind: input, shape index: {}]   ;;  %s1496_s1 = inlined_call_operand.hbm [shape: bf16[256,128], index: 1, kind: input, shape index: {}]   ;;  %s1497_s2 = inlined_call_operand.vmem [shape: f32[1,128], index: 2, kind: input, shape index: {}]   ;;  %s1498_s3 = inlined_call_operand.hbm [shape: bf16[128,256], index: 3, kind: input, shape index: {}]   ;;  %s1499_s4 = inlined_call_operand.vmem [shape: f32[1,256], index: 4, kind: input, shape index: {}]   ;;  %s1500_s5 = inlined_call_operand.hbm [shape: f32[256,256], index: 5, kind: output, shape index: {}]  }
   0x1   :  { %11 = vsyncpa [#allocation7], 0 }
   0x2   :  { %12 = vsyncpa [#allocation5], 0  ;;  %s1276_s18 = smov [#allocation6]   ;;  %s1182_s22 = scalar_lea.hbm %s1496_s1, 2048 }
   0x3   :  { %s30_s19 = sshll.u32 %s1276_s18, 4  ;;  %p1183_p0 = scmp.ne.s32.totalorder %s1496_s1, %s1182_s22  ;;  %s31_s19 = int_to_ptr.vmem [resolvable:$true] %s30_s19 }
   0x4   :  { %p1186_p1 = scmp.lt.u32.totalorder %s1182_s22, %s1496_s1 }
   0x6   :  { %p1188_p2 = pnand %p1186_p1, %p1183_p0 }
   0x8   :  { %1191 = shalt.err (!%p1188_p2)
}
   0x9   :  { %s1192_s27 = scalar_lea.vmem %s31_s19, 2048  ;;  %p1197_p4 = scmp.lt.s32.totalorder %s31_s19, %s31_s19 }
   0xa   :  { %p1193_p3 = scmp.ne.s32.totalorder %s31_s19, %s1192_s27  ;;  %p1198_p5 = scmp.lt.s32.totalorder %s1192_s27, %s1192_s27 }
   0xc   :  { %p1199_p6 = por %p1198_p5, %p1197_p4 }
   0xe   :  { %p1200_p7 = pnand %p1199_p6, %p1193_p3 }
  0x10   :  { %1203 = shalt.err (!%p1200_p7)
}
  0x11   :  { %s1277_s28 = smov 64   ;;  %s1278_s29 = smov 4  }
  0x12   :  { %36 = dma.hbm_to_vmem [thread:$0]  %s1496_s1, 2048, %s31_s19, [#allocation7], %s1277_s28, %s1277_s28, %s1278_s29  }
  0x13   :  { %s1279_s7 = smov [#allocation3]   ;;  %s1204_s11 = scalar_lea.hbm %s1495_s0, 8192 }
  0x14   :  { %s18_s8 = sshll.u32 %s1279_s7, 4  ;;  %p1205_p8 = scmp.ne.s32.totalorder %s1495_s0, %s1204_s11  ;;  %s19_s8 = int_to_ptr.vmem [resolvable:$true] %s18_s8 }
  0x15   :  { %p1208_p9 = scmp.lt.u32.totalorder %s1204_s11, %s1495_s0 }
  0x17   :  { %p1210_p10 = pnand %p1208_p9, %p1205_p8 }
  0x19   :  { %1213 = shalt.err (!%p1210_p10)
}
  0x1a   :  { %s1214_s16 = scalar_lea.vmem %s19_s8, 8192  ;;  %p1219_p12 = scmp.lt.s32.totalorder %s19_s8, %s19_s8 }
  0x1b   :  { %p1215_p11 = scmp.ne.s32.totalorder %s19_s8, %s1214_s16  ;;  %p1220_p13 = scmp.lt.s32.totalorder %s1214_s16, %s1214_s16 }
  0x1d   :  { %p1221_p0 = por %p1220_p13, %p1219_p12 }
  0x1f   :  { %p1222_p1 = pnand %p1221_p0, %p1215_p11 }
  0x21   :  { %1225 = shalt.err (!%p1222_p1)
}
  0x22   :  { %s1280_s1 = smov 256   ;;  %s1281_s17 = smov 16  }
  0x23   :  { %24 = dma.hbm_to_vmem [thread:$0]  %s1495_s0, 8192, %s19_s8, [#allocation4], %s1280_s1, %s1280_s1, %s1281_s17  }
  0x24   :  { %s1282_s20 = smov [#allocation8]   ;;  %s1226_s24 = scalar_lea.hbm %s1498_s3, 2048 }
  0x25   :  { %s44_s21 = sshll.u32 %s1282_s20, 4  ;;  %p1227_p2 = scmp.ne.s32.totalorder %s1498_s3, %s1226_s24  ;;  %s45_s21 = int_to_ptr.vmem [resolvable:$true] %s44_s21 }
  0x26   :  { %p1230_p3 = scmp.lt.u32.totalorder %s1226_s24, %s1498_s3 }
  0x28   :  { %p1232_p4 = pnand %p1230_p3, %p1227_p2 }
  0x2a   :  { %1235 = shalt.err (!%p1232_p4)
}
  0x2b   :  { %s1236_s29 = scalar_lea.vmem %s45_s21, 2048  ;;  %p1241_p6 = scmp.lt.s32.totalorder %s45_s21, %s45_s21 }
  0x2c   :  { %p1237_p5 = scmp.ne.s32.totalorder %s45_s21, %s1236_s29  ;;  %p1242_p7 = scmp.lt.s32.totalorder %s1236_s29, %s1236_s29 }
  0x2e   :  { %p1243_p8 = por %p1242_p7, %p1241_p6 }
  0x30   :  { %p1244_p9 = pnand %p1243_p8, %p1237_p5 }
  0x32   :  { %1247 = shalt.err (!%p1244_p9)
}
  0x33   :  { %s1283_s0 = smov 128   ;;  %s1284_s30 = smov 8  }
  0x34   :  { %50 = dma.hbm_to_vmem [thread:$0]  %s1498_s3, 2048, %s45_s21, [#allocation7], %s1283_s0, %s1283_s0, %s1284_s30  }
  0x35   :  { %1270 = dma.done.wait [#allocation4], 8192  }
  0x36   :  { %1271 = vsyncadd [#allocation4], 4294959104 }
  0x37   :  { %1272 = dma.done.wait [#allocation7], 4096  }
  0x38   :  { %1273 = vsyncadd [#allocation7], 4294963200  ;;  %v1078_v0 = vld [vmem:[#allocation6 + $0x40] sm:$0xff]   ;;  %v1080_v2 = vld [vmem:[#allocation6 + $0x48] sm:$0xff]  }
  0x39   :  { %v1079_v1 = vld [vmem:[#allocation6] sm:$0xff]   ;;  %955 = vmatprep.subr.bf16.mxu0 %v1078_v0  ;;  %v1081_v3 = vld [vmem:[#allocation6 + $0x8] sm:$0xff]   ;;  %v1082_v4 = vld [vmem:[#allocation6 + $0x50] sm:$0xff]  }
  0x3a   :  { %956 = vmatpush3.bf16.msra.mxu0 %v1079_v1  ;;  %v1083_v5 = vld [vmem:[#allocation6 + $0x10] sm:$0xff]   ;;  %v1084_v6 = vld [vmem:[#allocation6 + $0x58] sm:$0xff]   ;;  %v1086_v8 = vld [vmem:[#allocation6 + $0x60] sm:$0xff]  }
  0x3b   :  { %957 = vmatprep.subr.bf16.mxu0 %v1080_v2  ;;  %v1085_v7 = vld [vmem:[#allocation6 + $0x18] sm:$0xff]   ;;  %v1087_v9 = vld [vmem:[#allocation6 + $0x20] sm:$0xff]   ;;  %v1088_v10 = vld [vmem:[#allocation6 + $0x68] sm:$0xff]  }
  0x3c   :  { %v68_v11 = vld [vmem:[#allocation3 + $0x8] sm:$0xff]  ;;  %v70_v12 = vld [vmem:[#allocation3 + $0x18] sm:$0xff]  ;;  %v1090_v15 = vld [vmem:[#allocation6 + $0x70] sm:$0xff]  }
  0x3d   :  { %v132_v13 = vpack.c.bf16 %v70_v12, %v68_v11  ;;  %v1089_v14 = vld [vmem:[#allocation6 + $0x28] sm:$0xff]   ;;  %v1091_v16 = vld [vmem:[#allocation6 + $0x30] sm:$0xff]   ;;  %v1092_v17 = vld [vmem:[#allocation6 + $0x78] sm:$0xff]  }
  0x3e   :  { %958 = vmatpush3.bf16.msra.mxu0 %v1081_v3  ;;  %v1093_v18 = vld [vmem:[#allocation6 + $0x38] sm:$0xff]   ;;  %v67_v19 = vld [vmem:[#allocation3] sm:$0xff]  ;;  %v69_v20 = vld [vmem:[#allocation3 + $0x10] sm:$0xff] }
  0x3f   :  { %959 = vmatprep.subr.bf16.mxu0 %v1082_v4  ;;  %330 = vmatprep.mubr.bf16.mxu0 %v132_v13  ;;  %v72_v21 = vld [vmem:[#allocation3 + $0x28] sm:$0xff]  ;;  %v74_v22 = vld [vmem:[#allocation3 + $0x38] sm:$0xff]  ;;  %v131_v23 = vpack.c.bf16 %v69_v20, %v67_v19  ;;  %v71_v25 = vld [vmem:[#allocation3 + $0x20] sm:$0xff] }
  0x40   :  { %v134_v24 = vpack.c.bf16 %v74_v22, %v72_v21  ;;  %v73_v26 = vld [vmem:[#allocation3 + $0x30] sm:$0xff]  ;;  %v76_v27 = vld [vmem:[#allocation3 + $0x48] sm:$0xff]  ;;  %v78_v28 = vld [vmem:[#allocation3 + $0x58] sm:$0xff] }
  0x41   :  { %v133_v29 = vpack.c.bf16 %v73_v26, %v71_v25  ;;  %v1094_v30 = vld [vmem:[#allocation8 + $0x4] ss:$8 sps:$4 sm:$0xff]   ;;  %v1096_v31 = vld [vmem:[#allocation8] ss:$8 sps:$4 sm:$0xff]   ;;  %v136_v32 = vpack.c.bf16 %v78_v28, %v76_v27  ;;  %v1097_v33 = vld [vmem:[#allocation8 + $0x14] ss:$8 sps:$4 sm:$0xff]  }
  0x42   :  { %960 = vmatpush3.bf16.msra.mxu0 %v1083_v5  ;;  %647 = vmatprep.subr.bf16.mxu1 %v1094_v30  ;;  %v1099_v34 = vld [vmem:[#allocation8 + $0x10] ss:$8 sps:$4 sm:$0xff]   ;;  %v75_v35 = vld [vmem:[#allocation3 + $0x40] sm:$0xff]  ;;  %v80_v38 = vld [vmem:[#allocation3 + $0x68] sm:$0xff] }
  0x43   :  { %961 = vmatprep.subr.bf16.mxu0 %v1084_v6  ;;  %v77_v36 = vld [vmem:[#allocation3 + $0x50] sm:$0xff]  ;;  %648 = vmatpush1.bf16.msra.mxu1 %v1096_v31  ;;  %v1100_v37 = vld [vmem:[#allocation8 + $0x24] ss:$8 sps:$4 sm:$0xff]   ;;  %v82_v39 = vld [vmem:[#allocation3 + $0x78] sm:$0xff] }
  0x44   :  { %649 = vmatprep.subr.bf16.mxu1 %v1097_v33  ;;  %v1102_v40 = vld [vmem:[#allocation8 + $0x20] ss:$8 sps:$4 sm:$0xff]   ;;  %v135_v41 = vpack.c.bf16 %v77_v36, %v75_v35  ;;  %v138_v42 = vpack.c.bf16 %v82_v39, %v80_v38  ;;  %v81_v44 = vld [vmem:[#allocation3 + $0x70] sm:$0xff]  ;;  %v86_v46 = vld [vmem:[#allocation3 + $0x98] sm:$0xff] }
  0x45   :  { %v79_v43 = vld [vmem:[#allocation3 + $0x60] sm:$0xff]  ;;  %v84_v45 = vld [vmem:[#allocation3 + $0x88] sm:$0xff]  ;;  %v85_v50 = vld [vmem:[#allocation3 + $0x90] sm:$0xff] }
  0x46   :  { %962 = vmatpush3.bf16.msra.mxu0 %v1085_v7  ;;  %v137_v47 = vpack.c.bf16 %v81_v44, %v79_v43  ;;  %v140_v48 = vpack.c.bf16 %v86_v46, %v84_v45  ;;  %v83_v49 = vld [vmem:[#allocation3 + $0x80] sm:$0xff]  ;;  %v88_v51 = vld [vmem:[#allocation3 + $0xa8] sm:$0xff]  ;;  %v90_v52 = vld [vmem:[#allocation3 + $0xb8] sm:$0xff] }
  0x47   :  { %963 = vmatprep.subr.bf16.mxu0 %v1086_v8  ;;  %650 = vmatpush1.bf16.msra.mxu1 %v1099_v34  ;;  %v139_v53 = vpack.c.bf16 %v85_v50, %v83_v49  ;;  %v142_v54 = vpack.c.bf16 %v90_v52, %v88_v51  ;;  %v87_v55 = vld [vmem:[#allocation3 + $0xa0] sm:$0xff]  ;;  %v89_v56 = vld [vmem:[#allocation3 + $0xb0] sm:$0xff]  ;;  %v92_v57 = vld [vmem:[#allocation3 + $0xc8] sm:$0xff] }
  0x48   :  { %651 = vmatprep.subr.bf16.mxu1 %v1100_v37  ;;  %v94_v58 = vld [vmem:[#allocation3 + $0xd8] sm:$0xff]  ;;  %v141_v59 = vpack.c.bf16 %v89_v56, %v87_v55  ;;  %v91_v61 = vld [vmem:[#allocation3 + $0xc0] sm:$0xff]  ;;  %v93_v62 = vld [vmem:[#allocation3 + $0xd0] sm:$0xff]  ;;  %v1285_v55 = vmov 0  }
  0x49   :  { %v144_v60 = vpack.c.bf16 %v94_v58, %v92_v57  ;;  %v96_v63 = vld [vmem:[#allocation3 + $0xe8] sm:$0xff]  ;;  %v98_v0 = vld [vmem:[#allocation3 + $0xf8] sm:$0xff]  ;;  %v143_v1 = vpack.c.bf16 %v93_v62, %v91_v61  ;;  %v95_v3 = vld [vmem:[#allocation3 + $0xe0] sm:$0xff]  ;;  %679 = vmatprep.mubr.bf16.mxu1 %v1285_v55 }
  0x4a   :  { %964 = vmatpush3.bf16.msra.mxu0 %v1087_v9  ;;  %v146_v2 = vpack.c.bf16 %v98_v0, %v96_v63  ;;  %v97_v4 = vld [vmem:[#allocation3 + $0xf0] sm:$0xff]  ;;  %v100_v5 = vld [vmem:[#allocation3 + $0x108] sm:$0xff]  ;;  %v102_v6 = vld [vmem:[#allocation3 + $0x118] sm:$0xff] }
  0x4b   :  { %965 = vmatprep.subr.bf16.mxu0 %v1088_v10  ;;  %652 = vmatpush1.bf16.msra.mxu1 %v1102_v40  ;;  %v145_v7 = vpack.c.bf16 %v97_v4, %v95_v3  ;;  %v148_v8 = vpack.c.bf16 %v102_v6, %v100_v5  ;;  %v99_v9 = vld [vmem:[#allocation3 + $0x100] sm:$0xff]  ;;  %v101_v10 = vld [vmem:[#allocation3 + $0x110] sm:$0xff]  ;;  %v104_v11 = vld [vmem:[#allocation3 + $0x128] sm:$0xff] }
  0x4c   :  { %v106_v12 = vld [vmem:[#allocation3 + $0x138] sm:$0xff]  ;;  %v147_v13 = vpack.c.bf16 %v101_v10, %v99_v9  ;;  %v107_v21 = vld [vmem:[#allocation3 + $0x140] sm:$0xff]  ;;  %v109_v22 = vld [vmem:[#allocation3 + $0x150] sm:$0xff] }
  0x4d   :  { %v151_v25 = vpack.c.bf16 %v109_v22, %v107_v21  ;;  %v111_v27 = vld [vmem:[#allocation3 + $0x160] sm:$0xff]  ;;  %v113_v28 = vld [vmem:[#allocation3 + $0x170] sm:$0xff]  ;;  %v118_v30 = vld [vmem:[#allocation3 + $0x198] sm:$0xff] }
  0x4e   :  { %966 = vmatpush3.bf16.msra.mxu0 %v1089_v14  ;;  %v150_v14 = vpack.c.bf16 %v106_v12, %v104_v11  ;;  %v1103_v31 = vld [vmem:[#allocation8 + $0x34] ss:$8 sps:$4 sm:$0xff]   ;;  %v153_v33 = vpack.c.bf16 %v113_v28, %v111_v27  ;;  %v1106_v35 = vld [vmem:[#allocation8 + $0x44] ss:$8 sps:$4 sm:$0xff]   ;;  %v1108_v36 = vld [vmem:[#allocation8 + $0x40] ss:$8 sps:$4 sm:$0xff]  }
  0x4f   :  { %967 = vmatprep.subr.bf16.mxu0 %v1090_v15  ;;  %v103_v15 = vld [vmem:[#allocation3 + $0x120] sm:$0xff]  ;;  %653 = vmatprep.subr.bf16.mxu1 %v1103_v31  ;;  %v117_v38 = vld [vmem:[#allocation3 + $0x190] sm:$0xff]  ;;  %v120_v39 = vld [vmem:[#allocation3 + $0x1a8] sm:$0xff] }
  0x50   :  { %v115_v37 = vld [vmem:[#allocation3 + $0x180] sm:$0xff]  ;;  %v122_v40 = vld [vmem:[#allocation3 + $0x1b8] sm:$0xff]  ;;  %v124_v49 = vld [vmem:[#allocation3 + $0x1c8] sm:$0xff] }
  0x51   :  { %v155_v43 = vpack.c.bf16 %v117_v38, %v115_v37  ;;  %v158_v44 = vpack.c.bf16 %v122_v40, %v120_v39  ;;  %v1112_v45 = vld [vmem:[#allocation8 + $0x64] ss:$8 sps:$4 sm:$0xff]   ;;  %v1114_v46 = vld [vmem:[#allocation8 + $0x60] ss:$8 sps:$4 sm:$0xff]   ;;  %v126_v50 = vld [vmem:[#allocation3 + $0x1d8] sm:$0xff] }
  0x52   :  { %968 = vmatpush3.bf16.msra.mxu0 %v1091_v16  ;;  %v105_v16 = vld [vmem:[#allocation3 + $0x130] sm:$0xff]  ;;  %v123_v56 = vld [vmem:[#allocation3 + $0x1c0] sm:$0xff]  ;;  %v128_v58 = vld [vmem:[#allocation3 + $0x1e8] sm:$0xff] }
  0x53   :  { %969 = vmatprep.subr.bf16.mxu0 %v1092_v17  ;;  %v108_v17 = vld [vmem:[#allocation3 + $0x148] sm:$0xff]  ;;  %v149_v19 = vpack.c.bf16 %v105_v16, %v103_v15  ;;  %v1115_v51 = vld [vmem:[#allocation8 + $0x74] ss:$8 sps:$4 sm:$0xff]   ;;  %v1117_v52 = vld [vmem:[#allocation8 + $0x70] ss:$8 sps:$4 sm:$0xff]  }
  0x54   :  { %v125_v57 = vld [vmem:[#allocation3 + $0x1d0] sm:$0xff]  ;;  %v127_v62 = vld [vmem:[#allocation3 + $0x1e0] sm:$0xff] }
  0x55   :  { %v129_v63 = vld [vmem:[#allocation3 + $0x1f0] sm:$0xff] }
  0x56   :  { %970 = vmatpush3.bf16.msra.mxu0 %v1093_v18  ;;  %v110_v18 = vld [vmem:[#allocation3 + $0x158] sm:$0xff]  ;;  %v161_v0 = vpack.c.bf16 %v129_v63, %v127_v62 }
  0x57   :  { %v152_v20 = vpack.c.bf16 %v110_v18, %v108_v17 }
  0x59   :  { %331 = vmatmul.mubr.bf16.vlgmr.msra.gmra.mrb[0].mxu0 %v131_v23  ;;  %v112_v23 = vld [vmem:[#allocation3 + $0x168] sm:$0xff] }
  0x5a   :  { %338 = vmatprep.mubr.bf16.mxu0 %v134_v24  ;;  %v114_v24 = vld [vmem:[#allocation3 + $0x178] sm:$0xff] }
  0x5b   :  { %v154_v26 = vpack.c.bf16 %v114_v24, %v112_v23 }
  0x61   :  { %339 = vmatmul.mubr.bf16.gmra.mrb[4].mxu0 %v133_v29  ;;  %v116_v29 = vld [vmem:[#allocation3 + $0x188] sm:$0xff] }
  0x62   :  { %346 = vmatprep.mubr.bf16.mxu0 %v136_v32  ;;  %v1105_v32 = vld [vmem:[#allocation8 + $0x30] ss:$8 sps:$4 sm:$0xff]   ;;  %v156_v34 = vpack.c.bf16 %v118_v30, %v116_v29 }
  0x63   :  { %654 = vmatpush1.bf16.msra.mxu1 %v1105_v32 }
  0x64   :  { %655 = vmatprep.subr.bf16.mxu1 %v1106_v35 }
  0x67   :  { %656 = vmatpush1.bf16.msra.mxu1 %v1108_v36 }
  0x69   :  { %347 = vmatmul.mubr.bf16.gmra.mrb[8].mxu0 %v135_v41  ;;  %v1109_v41 = vld [vmem:[#allocation8 + $0x54] ss:$8 sps:$4 sm:$0xff]  }
  0x6a   :  { %354 = vmatprep.mubr.bf16.mxu0 %v138_v42  ;;  %v1111_v42 = vld [vmem:[#allocation8 + $0x50] ss:$8 sps:$4 sm:$0xff]   ;;  %657 = vmatprep.subr.bf16.mxu1 %v1109_v41 }
  0x6b   :  { %658 = vmatpush1.bf16.msra.mxu1 %v1111_v42 }
  0x6c   :  { %659 = vmatprep.subr.bf16.mxu1 %v1112_v45 }
  0x6f   :  { %660 = vmatpush1.bf16.msra.mxu1 %v1114_v46 }
  0x70   :  { %661 = vmatprep.subr.bf16.mxu1 %v1115_v51 }
  0x71   :  { %355 = vmatmul.mubr.bf16.gmra.mrb[12].mxu0 %v137_v47  ;;  %v119_v47 = vld [vmem:[#allocation3 + $0x1a0] sm:$0xff] }
  0x72   :  { %362 = vmatprep.mubr.bf16.mxu0 %v140_v48  ;;  %v121_v48 = vld [vmem:[#allocation3 + $0x1b0] sm:$0xff] }
  0x73   :  { %662 = vmatpush1.bf16.msra.mxu1 %v1117_v52 }
  0x79   :  { %363 = vmatmul.mubr.bf16.gmra.mrb[16].mxu0 %v139_v53  ;;  %v157_v53 = vpack.c.bf16 %v121_v48, %v119_v47 }
  0x7a   :  { %370 = vmatprep.mubr.bf16.mxu0 %v142_v54  ;;  %v160_v54 = vpack.c.bf16 %v126_v50, %v124_v49 }
  0x81   :  { %371 = vmatmul.mubr.bf16.gmra.mrb[20].mxu0 %v141_v59  ;;  %v130_v59 = vld [vmem:[#allocation3 + $0x1f8] sm:$0xff] }
  0x82   :  { %378 = vmatprep.mubr.bf16.mxu0 %v144_v60  ;;  %v159_v60 = vpack.c.bf16 %v125_v57, %v123_v56  ;;  %v162_v61 = vpack.c.bf16 %v130_v59, %v128_v58 }
  0x89   :  { %379 = vmatmul.mubr.bf16.gmra.mrb[24].mxu0 %v143_v1 }
  0x8a   :  { %386 = vmatprep.mubr.bf16.mxu0 %v146_v2  ;;  %v1360_v2 = vld [vmem:[%s1497_s2] ss:$0 sm:$0xff] }
  0x91   :  { %387 = vmatmul.mubr.bf16.gmra.mrb[28].mxu0 %v145_v7 }
  0x92   :  { %394 = vmatprep.mubr.bf16.mxu0 %v148_v8 }
  0x99   :  { %395 = vmatmul.mubr.bf16.gmra.mrb[32].mxu0 %v147_v13 }
  0x9a   :  { %402 = vmatprep.mubr.bf16.mxu0 %v150_v14 }
  0xa1   :  { %403 = vmatmul.mubr.bf16.gmra.mrb[36].mxu0 %v149_v19 }
  0xa2   :  { %410 = vmatprep.mubr.bf16.mxu0 %v152_v20 }
  0xa9   :  { %411 = vmatmul.mubr.bf16.gmra.mrb[40].mxu0 %v151_v25 }
  0xaa   :  { %418 = vmatprep.mubr.bf16.mxu0 %v154_v26 }
  0xb1   :  { %419 = vmatmul.mubr.bf16.gmra.mrb[44].mxu0 %v153_v33 }
  0xb2   :  { %426 = vmatprep.mubr.bf16.mxu0 %v156_v34 }
  0xb9   :  { %427 = vmatmul.mubr.bf16.gmra.mrb[48].mxu0 %v155_v43 }
  0xba   :  { %434 = vmatprep.mubr.bf16.mxu0 %v158_v44 }
  0xc1   :  { %435 = vmatmul.mubr.bf16.gmra.mrb[52].mxu0 %v157_v53 }
  0xc2   :  { %442 = vmatprep.mubr.bf16.mxu0 %v160_v54 }
  0xc9   :  { %443 = vmatmul.mubr.bf16.gmra.mrb[56].mxu0 %v159_v60 }
  0xca   :  { %450 = vmatprep.mubr.bf16.mxu0 %v162_v61 }
  0xd1   :  { %451 = vmatmul.mubr.bf16.gmra.mrb[60].mxu0 %v161_v0 }
 0x12c   :  { %v971_v1 = vpop.f32.mrb[0].mxu0 }
 0x12d   :  { %v972_v3 = vpop.f32.mrb[1].mxu0 }
 0x12e   :  { %v973_v4 = vadd.f32 %v972_v3, %v971_v1  ;;  %v974_v5 = vpop.f32.mrb[2].mxu0 }
 0x12f   :  { %v975_v6 = vpop.f32.mrb[3].mxu0 }
 0x130   :  { %v333_v7 = vadd.f32 %v973_v4, %v1360_v2  ;;  %v976_v8 = vadd.f32 %v975_v6, %v974_v5 }
 0x132   :  { %v336_v9 = vadd.f32 %v976_v8, %v1360_v2  ;;  %1118 = vtanh.f32 %v333_v7 }
 0x134   :  { %1120 = vtanh.f32 %v336_v9  ;;  %v977_v10 = vpop.f32.mrb[4].mxu0 }
 0x135   :  { %v978_v11 = vpop.f32.mrb[5].mxu0 }
 0x136   :  { %v979_v12 = vadd.f32 %v978_v11, %v977_v10  ;;  %v980_v13 = vpop.f32.mrb[6].mxu0 }
 0x137   :  { %v981_v14 = vpop.f32.mrb[7].mxu0 }
 0x138   :  { %v341_v15 = vadd.f32 %v979_v12, %v1360_v2  ;;  %v982_v16 = vadd.f32 %v981_v14, %v980_v13 }
 0x13a   :  { %v344_v17 = vadd.f32 %v982_v16, %v1360_v2  ;;  %1122 = vtanh.f32 %v341_v15 }
 0x13c   :  { %1124 = vtanh.f32 %v344_v17  ;;  %v983_v18 = vpop.f32.mrb[8].mxu0  ;;  %v1119_v19 = vpop.eup %1118 }
 0x13d   :  { %v984_v20 = vpop.f32.mrb[9].mxu0 }
 0x13e   :  { %v1121_v21 = vpop.eup %1120  ;;  %v985_v22 = vadd.f32 %v984_v20, %v983_v18  ;;  %v986_v23 = vpop.f32.mrb[10].mxu0 }
 0x13f   :  { %v987_v24 = vpop.f32.mrb[11].mxu0  ;;  %v491_v25 = vpack.c.bf16 %v1121_v21, %v1119_v19 }
 0x140   :  { %v349_v26 = vadd.f32 %v985_v22, %v1360_v2  ;;  %v988_v27 = vadd.f32 %v987_v24, %v986_v23 }
 0x141   :  { %680 = vmatmul.mubr.bf16.vlgmr.msra.gmra.mrb[0].mxu1 %v491_v25 }
 0x142   :  { %v352_v28 = vadd.f32 %v988_v27, %v1360_v2  ;;  %689 = vmatprep.mubr.bf16.mxu1 %v1285_v55  ;;  %1126 = vtanh.f32 %v349_v26 }
 0x144   :  { %1128 = vtanh.f32 %v352_v28  ;;  %v989_v29 = vpop.f32.mrb[12].mxu0  ;;  %v1123_v30 = vpop.eup %1122 }
 0x145   :  { %v990_v31 = vpop.f32.mrb[13].mxu0 }
 0x146   :  { %v1125_v32 = vpop.eup %1124  ;;  %v991_v33 = vadd.f32 %v990_v31, %v989_v29  ;;  %v992_v34 = vpop.f32.mrb[14].mxu0 }
 0x147   :  { %v993_v35 = vpop.f32.mrb[15].mxu0  ;;  %v492_v36 = vpack.c.bf16 %v1125_v32, %v1123_v30 }
 0x148   :  { %v357_v37 = vadd.f32 %v991_v33, %v1360_v2  ;;  %v994_v38 = vadd.f32 %v993_v35, %v992_v34 }
 0x149   :  { %690 = vmatmul.mubr.bf16.gmra.mrb[4].mxu1 %v492_v36 }
 0x14a   :  { %v360_v39 = vadd.f32 %v994_v38, %v1360_v2  ;;  %699 = vmatprep.mubr.bf16.mxu1 %v1285_v55  ;;  %1130 = vtanh.f32 %v357_v37 }
 0x14c   :  { %1132 = vtanh.f32 %v360_v39  ;;  %v995_v40 = vpop.f32.mrb[16].mxu0  ;;  %v1127_v41 = vpop.eup %1126 }
 0x14d   :  { %v996_v42 = vpop.f32.mrb[17].mxu0 }
 0x14e   :  { %v1129_v43 = vpop.eup %1128  ;;  %v997_v44 = vadd.f32 %v996_v42, %v995_v40  ;;  %v998_v45 = vpop.f32.mrb[18].mxu0 }
 0x14f   :  { %v999_v46 = vpop.f32.mrb[19].mxu0  ;;  %v493_v47 = vpack.c.bf16 %v1129_v43, %v1127_v41 }
 0x150   :  { %v365_v48 = vadd.f32 %v997_v44, %v1360_v2  ;;  %v1000_v49 = vadd.f32 %v999_v46, %v998_v45 }
 0x151   :  { %700 = vmatmul.mubr.bf16.gmra.mrb[8].mxu1 %v493_v47 }
 0x152   :  { %v368_v50 = vadd.f32 %v1000_v49, %v1360_v2  ;;  %709 = vmatprep.mubr.bf16.mxu1 %v1285_v55  ;;  %1134 = vtanh.f32 %v365_v48 }
 0x154   :  { %1136 = vtanh.f32 %v368_v50  ;;  %v1001_v51 = vpop.f32.mrb[20].mxu0  ;;  %v1131_v52 = vpop.eup %1130 }
 0x155   :  { %v1002_v53 = vpop.f32.mrb[21].mxu0 }
 0x156   :  { %v1133_v54 = vpop.eup %1132  ;;  %v1003_v56 = vadd.f32 %v1002_v53, %v1001_v51  ;;  %v1004_v57 = vpop.f32.mrb[22].mxu0 }
 0x157   :  { %v1005_v58 = vpop.f32.mrb[23].mxu0  ;;  %v494_v59 = vpack.c.bf16 %v1133_v54, %v1131_v52 }
 0x158   :  { %v373_v60 = vadd.f32 %v1003_v56, %v1360_v2  ;;  %v1006_v61 = vadd.f32 %v1005_v58, %v1004_v57 }
 0x159   :  { %710 = vmatmul.mubr.bf16.gmra.mrb[12].mxu1 %v494_v59 }
 0x15a   :  { %v376_v62 = vadd.f32 %v1006_v61, %v1360_v2  ;;  %719 = vmatprep.mubr.bf16.mxu1 %v1285_v55  ;;  %1138 = vtanh.f32 %v373_v60 }
 0x15c   :  { %1140 = vtanh.f32 %v376_v62  ;;  %v1007_v63 = vpop.f32.mrb[24].mxu0  ;;  %v1135_v0 = vpop.eup %1134 }
 0x15d   :  { %v1008_v1 = vpop.f32.mrb[25].mxu0 }
 0x15e   :  { %v1137_v3 = vpop.eup %1136  ;;  %v1009_v4 = vadd.f32 %v1008_v1, %v1007_v63  ;;  %v1010_v5 = vpop.f32.mrb[26].mxu0 }
 0x15f   :  { %v1011_v6 = vpop.f32.mrb[27].mxu0  ;;  %v495_v7 = vpack.c.bf16 %v1137_v3, %v1135_v0 }
 0x160   :  { %v381_v8 = vadd.f32 %v1009_v4, %v1360_v2  ;;  %v1012_v9 = vadd.f32 %v1011_v6, %v1010_v5 }
 0x161   :  { %720 = vmatmul.mubr.bf16.gmra.mrb[16].mxu1 %v495_v7 }
 0x162   :  { %v384_v10 = vadd.f32 %v1012_v9, %v1360_v2  ;;  %729 = vmatprep.mubr.bf16.mxu1 %v1285_v55  ;;  %1142 = vtanh.f32 %v381_v8 }
 0x164   :  { %1144 = vtanh.f32 %v384_v10  ;;  %v1013_v11 = vpop.f32.mrb[28].mxu0  ;;  %v1139_v12 = vpop.eup %1138 }
 0x165   :  { %v1014_v13 = vpop.f32.mrb[29].mxu0 }
 0x166   :  { %v1141_v14 = vpop.eup %1140  ;;  %v1015_v15 = vadd.f32 %v1014_v13, %v1013_v11  ;;  %v1016_v16 = vpop.f32.mrb[30].mxu0 }
 0x167   :  { %v1017_v17 = vpop.f32.mrb[31].mxu0  ;;  %v496_v18 = vpack.c.bf16 %v1141_v14, %v1139_v12 }
 0x168   :  { %v389_v19 = vadd.f32 %v1015_v15, %v1360_v2  ;;  %v1018_v20 = vadd.f32 %v1017_v17, %v1016_v16 }
 0x169   :  { %730 = vmatmul.mubr.bf16.gmra.mrb[20].mxu1 %v496_v18 }
 0x16a   :  { %v392_v21 = vadd.f32 %v1018_v20, %v1360_v2  ;;  %739 = vmatprep.mubr.bf16.mxu1 %v1285_v55  ;;  %1146 = vtanh.f32 %v389_v19 }
 0x16c   :  { %1148 = vtanh.f32 %v392_v21  ;;  %v1019_v22 = vpop.f32.mrb[32].mxu0  ;;  %v1143_v23 = vpop.eup %1142 }
 0x16d   :  { %v1020_v24 = vpop.f32.mrb[33].mxu0 }
 0x16e   :  { %v1145_v25 = vpop.eup %1144  ;;  %v1021_v26 = vadd.f32 %v1020_v24, %v1019_v22  ;;  %v1022_v27 = vpop.f32.mrb[34].mxu0 }
 0x16f   :  { %v1023_v28 = vpop.f32.mrb[35].mxu0  ;;  %v497_v29 = vpack.c.bf16 %v1145_v25, %v1143_v23 }
 0x170   :  { %v397_v30 = vadd.f32 %v1021_v26, %v1360_v2  ;;  %v1024_v31 = vadd.f32 %v1023_v28, %v1022_v27 }
 0x171   :  { %740 = vmatmul.mubr.bf16.gmra.mrb[24].mxu1 %v497_v29 }
 0x172   :  { %v400_v32 = vadd.f32 %v1024_v31, %v1360_v2  ;;  %749 = vmatprep.mubr.bf16.mxu1 %v1285_v55  ;;  %1150 = vtanh.f32 %v397_v30 }
 0x174   :  { %1152 = vtanh.f32 %v400_v32  ;;  %v1025_v33 = vpop.f32.mrb[36].mxu0  ;;  %v1147_v34 = vpop.eup %1146 }
 0x175   :  { %v1026_v35 = vpop.f32.mrb[37].mxu0 }
 0x176   :  { %v1149_v36 = vpop.eup %1148  ;;  %v1027_v37 = vadd.f32 %v1026_v35, %v1025_v33  ;;  %v1028_v38 = vpop.f32.mrb[38].mxu0 }
 0x177   :  { %v1029_v39 = vpop.f32.mrb[39].mxu0  ;;  %v498_v40 = vpack.c.bf16 %v1149_v36, %v1147_v34 }
 0x178   :  { %v405_v41 = vadd.f32 %v1027_v37, %v1360_v2  ;;  %v1030_v42 = vadd.f32 %v1029_v39, %v1028_v38 }
 0x179   :  { %750 = vmatmul.mubr.bf16.gmra.mrb[28].mxu1 %v498_v40 }
 0x17a   :  { %v408_v43 = vadd.f32 %v1030_v42, %v1360_v2  ;;  %759 = vmatprep.mubr.bf16.mxu1 %v1285_v55  ;;  %1154 = vtanh.f32 %v405_v41 }
 0x17c   :  { %1156 = vtanh.f32 %v408_v43  ;;  %v1031_v44 = vpop.f32.mrb[40].mxu0  ;;  %v1151_v45 = vpop.eup %1150 }
 0x17d   :  { %v1032_v46 = vpop.f32.mrb[41].mxu0 }
 0x17e   :  { %v1153_v47 = vpop.eup %1152  ;;  %v1033_v48 = vadd.f32 %v1032_v46, %v1031_v44  ;;  %v1034_v49 = vpop.f32.mrb[42].mxu0 }
 0x17f   :  { %v1035_v50 = vpop.f32.mrb[43].mxu0  ;;  %v499_v51 = vpack.c.bf16 %v1153_v47, %v1151_v45 }
 0x180   :  { %v413_v52 = vadd.f32 %v1033_v48, %v1360_v2  ;;  %v1036_v53 = vadd.f32 %v1035_v50, %v1034_v49 }
 0x181   :  { %760 = vmatmul.mubr.bf16.gmra.mrb[32].mxu1 %v499_v51 }
 0x182   :  { %v416_v54 = vadd.f32 %v1036_v53, %v1360_v2  ;;  %769 = vmatprep.mubr.bf16.mxu1 %v1285_v55  ;;  %1158 = vtanh.f32 %v413_v52 }
 0x184   :  { %1160 = vtanh.f32 %v416_v54  ;;  %v1037_v56 = vpop.f32.mrb[44].mxu0  ;;  %v1155_v57 = vpop.eup %1154  ;;  %v557_v54 = vlaneseq }
 0x185   :  { %v1038_v58 = vpop.f32.mrb[45].mxu0 }
 0x186   :  { %v1157_v59 = vpop.eup %1156  ;;  %v1039_v60 = vadd.f32 %v1038_v58, %v1037_v56  ;;  %v1040_v61 = vpop.f32.mrb[46].mxu0  ;;  %v558_v56 = vshrl.u32 %v557_v54, 7 }
 0x187   :  { %v1041_v62 = vpop.f32.mrb[47].mxu0  ;;  %v500_v63 = vpack.c.bf16 %v1157_v59, %v1155_v57 }
 0x188   :  { %v421_v0 = vadd.f32 %v1039_v60, %v1360_v2  ;;  %v1042_v1 = vadd.f32 %v1041_v62, %v1040_v61  ;;  %v559_v57 = vsub.s32 0, %v558_v56  ;;  %v563_v58 = vsub.s32 1, %v558_v56 }
 0x189   :  { %770 = vmatmul.mubr.bf16.gmra.mrb[36].mxu1 %v500_v63 }
 0x18a   :  { %v424_v3 = vadd.f32 %v1042_v1, %v1360_v2  ;;  %779 = vmatprep.mubr.bf16.mxu1 %v1285_v55  ;;  %1162 = vtanh.f32 %v421_v0 }
 0x18c   :  { %1164 = vtanh.f32 %v424_v3  ;;  %v1043_v4 = vpop.f32.mrb[48].mxu0  ;;  %v1159_v5 = vpop.eup %1158 }
 0x18d   :  { %v1044_v6 = vpop.f32.mrb[49].mxu0 }
 0x18e   :  { %v1161_v7 = vpop.eup %1160  ;;  %v1045_v8 = vadd.f32 %v1044_v6, %v1043_v4  ;;  %v1046_v9 = vpop.f32.mrb[50].mxu0 }
 0x18f   :  { %v1047_v10 = vpop.f32.mrb[51].mxu0  ;;  %v501_v11 = vpack.c.bf16 %v1161_v7, %v1159_v5 }
 0x190   :  { %v429_v12 = vadd.f32 %v1045_v8, %v1360_v2  ;;  %v1048_v13 = vadd.f32 %v1047_v10, %v1046_v9 }
 0x191   :  { %780 = vmatmul.mubr.bf16.gmra.mrb[40].mxu1 %v501_v11 }
 0x192   :  { %v432_v14 = vadd.f32 %v1048_v13, %v1360_v2  ;;  %789 = vmatprep.mubr.bf16.mxu1 %v1285_v55  ;;  %1166 = vtanh.f32 %v429_v12 }
 0x194   :  { %1168 = vtanh.f32 %v432_v14  ;;  %v1049_v15 = vpop.f32.mrb[52].mxu0  ;;  %v1163_v16 = vpop.eup %1162 }
 0x195   :  { %v1050_v17 = vpop.f32.mrb[53].mxu0 }
 0x196   :  { %v1165_v18 = vpop.eup %1164  ;;  %v1051_v19 = vadd.f32 %v1050_v17, %v1049_v15  ;;  %v1052_v20 = vpop.f32.mrb[54].mxu0 }
 0x197   :  { %v1053_v21 = vpop.f32.mrb[55].mxu0  ;;  %v502_v22 = vpack.c.bf16 %v1165_v18, %v1163_v16 }
 0x198   :  { %v437_v23 = vadd.f32 %v1051_v19, %v1360_v2  ;;  %v1054_v24 = vadd.f32 %v1053_v21, %v1052_v20 }
 0x199   :  { %790 = vmatmul.mubr.bf16.gmra.mrb[44].mxu1 %v502_v22 }
 0x19a   :  { %v440_v25 = vadd.f32 %v1054_v24, %v1360_v2  ;;  %799 = vmatprep.mubr.bf16.mxu1 %v1285_v55  ;;  %1170 = vtanh.f32 %v437_v23 }
 0x19c   :  { %1172 = vtanh.f32 %v440_v25  ;;  %v1055_v26 = vpop.f32.mrb[56].mxu0  ;;  %v1167_v27 = vpop.eup %1166 }
 0x19d   :  { %v1056_v28 = vpop.f32.mrb[57].mxu0 }
 0x19e   :  { %v1169_v29 = vpop.eup %1168  ;;  %v1057_v30 = vadd.f32 %v1056_v28, %v1055_v26  ;;  %v1058_v31 = vpop.f32.mrb[58].mxu0 }
 0x19f   :  { %v1059_v32 = vpop.f32.mrb[59].mxu0  ;;  %v503_v33 = vpack.c.bf16 %v1169_v29, %v1167_v27 }
 0x1a0   :  { %v445_v34 = vadd.f32 %v1057_v30, %v1360_v2  ;;  %v1060_v35 = vadd.f32 %v1059_v32, %v1058_v31 }
 0x1a1   :  { %800 = vmatmul.mubr.bf16.gmra.mrb[48].mxu1 %v503_v33 }
 0x1a2   :  { %v448_v36 = vadd.f32 %v1060_v35, %v1360_v2  ;;  %809 = vmatprep.mubr.bf16.mxu1 %v1285_v55  ;;  %1174 = vtanh.f32 %v445_v34 }
 0x1a4   :  { %1176 = vtanh.f32 %v448_v36  ;;  %v1061_v37 = vpop.f32.mrb[60].mxu0  ;;  %v1171_v38 = vpop.eup %1170 }
 0x1a5   :  { %v1062_v39 = vpop.f32.mrb[61].mxu0 }
 0x1a6   :  { %v1173_v40 = vpop.eup %1172  ;;  %v1063_v41 = vadd.f32 %v1062_v39, %v1061_v37  ;;  %v1064_v42 = vpop.f32.mrb[62].mxu0 }
 0x1a7   :  { %v1065_v43 = vpop.f32.mrb[63].mxu0  ;;  %v504_v44 = vpack.c.bf16 %v1173_v40, %v1171_v38 }
 0x1a8   :  { %v453_v45 = vadd.f32 %v1063_v41, %v1360_v2  ;;  %v1066_v46 = vadd.f32 %v1065_v43, %v1064_v42 }
 0x1a9   :  { %810 = vmatmul.mubr.bf16.gmra.mrb[52].mxu1 %v504_v44 }
 0x1aa   :  { %v456_v47 = vadd.f32 %v1066_v46, %v1360_v2  ;;  %819 = vmatprep.mubr.bf16.mxu1 %v1285_v55  ;;  %1178 = vtanh.f32 %v453_v45  ;;  %v555_v2 = vld [vmem:[%s1499_s4] sm:$0x3]  ;;  %s1286_s4 = smov [#allocation9]  }
 0x1ab   :  { %v1412_v59 = vrot.slane %v555_v2, %v559_v57  ;;  %v1414_v60 = vrot.slane %v555_v2, %v563_v58  ;;  %s909_s10 = sshll.u32 %s1286_s4, 4  ;;  %s910_s10 = int_to_ptr.vmem [resolvable:$true] %s909_s10 }
 0x1ac   :  { %1180 = vtanh.f32 %v456_v47  ;;  %v1175_v48 = vpop.eup %1174  ;;  %s1248_s11 = scalar_lea.vmem %s910_s10, 8192  ;;  %p1253_p11 = scmp.lt.s32.totalorder %s910_s10, %s910_s10 }
 0x1ad   :  { %p1249_p10 = scmp.ne.s32.totalorder %s910_s10, %s1248_s11  ;;  %p1254_p12 = scmp.lt.s32.totalorder %s1248_s11, %s1248_s11 }
 0x1ae   :  { %v1177_v49 = vpop.eup %1176 }
 0x1af   :  { %v505_v50 = vpack.c.bf16 %v1177_v49, %v1175_v48  ;;  %p1255_p13 = por %p1254_p12, %p1253_p11 }
 0x1b1   :  { %820 = vmatmul.mubr.bf16.gmra.mrb[56].mxu1 %v505_v50  ;;  %p1256_p0 = pnand %p1255_p13, %p1249_p10 }
 0x1b2   :  { %829 = vmatprep.mubr.bf16.mxu1 %v1285_v55 }
 0x1b4   :  { %v1179_v51 = vpop.eup %1178 }
 0x1b6   :  { %v1181_v52 = vpop.eup %1180 }
 0x1b7   :  { %v506_v53 = vpack.c.bf16 %v1181_v52, %v1179_v51 }
 0x1b9   :  { %830 = vmatmul.mubr.bf16.gmra.mrb[60].mxu1 %v506_v53 }
 0x214   :  { %v681_v61 = vpop.f32.mrb[0].mxu1 }
 0x215   :  { %v682_v62 = vadd.f32 %v681_v61, %v1412_v59  ;;  %v683_v55 = vpop.f32.mrb[1].mxu1 }
 0x216   :  { %v684_v63 = vadd.f32 %v683_v55, %v1414_v60  ;;  %v685_v0 = vpop.f32.mrb[2].mxu1 }
 0x217   :  { %840 = vst [vmem:[#allocation9] sm:$0xff] %v682_v62  ;;  %v686_v1 = vadd.f32 %v685_v0, %v1412_v59  ;;  %v687_v3 = vpop.f32.mrb[3].mxu1 }
 0x218   :  { %841 = vst [vmem:[#allocation9 + $0x8] sm:$0xff] %v684_v63  ;;  %v688_v4 = vadd.f32 %v687_v3, %v1414_v60 }
 0x219   :  { %842 = vst [vmem:[#allocation9 + $0x10] sm:$0xff] %v686_v1 }
 0x21a   :  { %843 = vst [vmem:[#allocation9 + $0x18] sm:$0xff] %v688_v4 }
 0x21c   :  { %v691_v5 = vpop.f32.mrb[4].mxu1 }
 0x21d   :  { %v692_v6 = vadd.f32 %v691_v5, %v1412_v59  ;;  %v693_v7 = vpop.f32.mrb[5].mxu1 }
 0x21e   :  { %v694_v8 = vadd.f32 %v693_v7, %v1414_v60  ;;  %v695_v9 = vpop.f32.mrb[6].mxu1 }
 0x21f   :  { %844 = vst [vmem:[#allocation9 + $0x20] sm:$0xff] %v692_v6  ;;  %v696_v10 = vadd.f32 %v695_v9, %v1412_v59  ;;  %v697_v11 = vpop.f32.mrb[7].mxu1 }
 0x220   :  { %845 = vst [vmem:[#allocation9 + $0x28] sm:$0xff] %v694_v8  ;;  %v698_v12 = vadd.f32 %v697_v11, %v1414_v60 }
 0x221   :  { %846 = vst [vmem:[#allocation9 + $0x30] sm:$0xff] %v696_v10 }
 0x222   :  { %847 = vst [vmem:[#allocation9 + $0x38] sm:$0xff] %v698_v12 }
 0x224   :  { %v701_v13 = vpop.f32.mrb[8].mxu1 }
 0x225   :  { %v702_v14 = vadd.f32 %v701_v13, %v1412_v59  ;;  %v703_v15 = vpop.f32.mrb[9].mxu1 }
 0x226   :  { %v704_v16 = vadd.f32 %v703_v15, %v1414_v60  ;;  %v705_v17 = vpop.f32.mrb[10].mxu1 }
 0x227   :  { %848 = vst [vmem:[#allocation9 + $0x40] sm:$0xff] %v702_v14  ;;  %v706_v18 = vadd.f32 %v705_v17, %v1412_v59  ;;  %v707_v19 = vpop.f32.mrb[11].mxu1 }
 0x228   :  { %849 = vst [vmem:[#allocation9 + $0x48] sm:$0xff] %v704_v16  ;;  %v708_v20 = vadd.f32 %v707_v19, %v1414_v60 }
 0x229   :  { %850 = vst [vmem:[#allocation9 + $0x50] sm:$0xff] %v706_v18 }
 0x22a   :  { %851 = vst [vmem:[#allocation9 + $0x58] sm:$0xff] %v708_v20 }
 0x22c   :  { %v711_v21 = vpop.f32.mrb[12].mxu1 }
 0x22d   :  { %v712_v22 = vadd.f32 %v711_v21, %v1412_v59  ;;  %v713_v23 = vpop.f32.mrb[13].mxu1 }
 0x22e   :  { %v714_v24 = vadd.f32 %v713_v23, %v1414_v60  ;;  %v715_v25 = vpop.f32.mrb[14].mxu1 }
 0x22f   :  { %852 = vst [vmem:[#allocation9 + $0x60] sm:$0xff] %v712_v22  ;;  %v716_v26 = vadd.f32 %v715_v25, %v1412_v59  ;;  %v717_v27 = vpop.f32.mrb[15].mxu1 }
 0x230   :  { %853 = vst [vmem:[#allocation9 + $0x68] sm:$0xff] %v714_v24  ;;  %v718_v28 = vadd.f32 %v717_v27, %v1414_v60 }
 0x231   :  { %854 = vst [vmem:[#allocation9 + $0x70] sm:$0xff] %v716_v26 }
 0x232   :  { %855 = vst [vmem:[#allocation9 + $0x78] sm:$0xff] %v718_v28 }
 0x234   :  { %v721_v29 = vpop.f32.mrb[16].mxu1 }
 0x235   :  { %v722_v30 = vadd.f32 %v721_v29, %v1412_v59  ;;  %v723_v31 = vpop.f32.mrb[17].mxu1 }
 0x236   :  { %v724_v32 = vadd.f32 %v723_v31, %v1414_v60  ;;  %v725_v33 = vpop.f32.mrb[18].mxu1 }
 0x237   :  { %856 = vst [vmem:[#allocation9 + $0x80] sm:$0xff] %v722_v30  ;;  %v726_v34 = vadd.f32 %v725_v33, %v1412_v59  ;;  %v727_v35 = vpop.f32.mrb[19].mxu1 }
 0x238   :  { %857 = vst [vmem:[#allocation9 + $0x88] sm:$0xff] %v724_v32  ;;  %v728_v36 = vadd.f32 %v727_v35, %v1414_v60 }
 0x239   :  { %858 = vst [vmem:[#allocation9 + $0x90] sm:$0xff] %v726_v34 }
 0x23a   :  { %859 = vst [vmem:[#allocation9 + $0x98] sm:$0xff] %v728_v36 }
 0x23c   :  { %v731_v37 = vpop.f32.mrb[20].mxu1 }
 0x23d   :  { %v732_v38 = vadd.f32 %v731_v37, %v1412_v59  ;;  %v733_v39 = vpop.f32.mrb[21].mxu1 }
 0x23e   :  { %v734_v40 = vadd.f32 %v733_v39, %v1414_v60  ;;  %v735_v41 = vpop.f32.mrb[22].mxu1 }
 0x23f   :  { %860 = vst [vmem:[#allocation9 + $0xa0] sm:$0xff] %v732_v38  ;;  %v736_v42 = vadd.f32 %v735_v41, %v1412_v59  ;;  %v737_v43 = vpop.f32.mrb[23].mxu1 }
 0x240   :  { %861 = vst [vmem:[#allocation9 + $0xa8] sm:$0xff] %v734_v40  ;;  %v738_v44 = vadd.f32 %v737_v43, %v1414_v60 }
 0x241   :  { %862 = vst [vmem:[#allocation9 + $0xb0] sm:$0xff] %v736_v42 }
 0x242   :  { %863 = vst [vmem:[#allocation9 + $0xb8] sm:$0xff] %v738_v44 }
 0x244   :  { %v741_v45 = vpop.f32.mrb[24].mxu1 }
 0x245   :  { %v742_v46 = vadd.f32 %v741_v45, %v1412_v59  ;;  %v743_v47 = vpop.f32.mrb[25].mxu1 }
 0x246   :  { %v744_v48 = vadd.f32 %v743_v47, %v1414_v60  ;;  %v745_v49 = vpop.f32.mrb[26].mxu1 }
 0x247   :  { %864 = vst [vmem:[#allocation9 + $0xc0] sm:$0xff] %v742_v46  ;;  %v746_v50 = vadd.f32 %v745_v49, %v1412_v59  ;;  %v747_v51 = vpop.f32.mrb[27].mxu1 }
 0x248   :  { %865 = vst [vmem:[#allocation9 + $0xc8] sm:$0xff] %v744_v48  ;;  %v748_v52 = vadd.f32 %v747_v51, %v1414_v60 }
 0x249   :  { %866 = vst [vmem:[#allocation9 + $0xd0] sm:$0xff] %v746_v50 }
 0x24a   :  { %867 = vst [vmem:[#allocation9 + $0xd8] sm:$0xff] %v748_v52 }
 0x24c   :  { %v751_v53 = vpop.f32.mrb[28].mxu1 }
 0x24d   :  { %v752_v54 = vadd.f32 %v751_v53, %v1412_v59  ;;  %v753_v56 = vpop.f32.mrb[29].mxu1 }
 0x24e   :  { %v754_v57 = vadd.f32 %v753_v56, %v1414_v60  ;;  %v755_v2 = vpop.f32.mrb[30].mxu1 }
 0x24f   :  { %868 = vst [vmem:[#allocation9 + $0xe0] sm:$0xff] %v752_v54  ;;  %v756_v58 = vadd.f32 %v755_v2, %v1412_v59  ;;  %v757_v61 = vpop.f32.mrb[31].mxu1 }
 0x250   :  { %869 = vst [vmem:[#allocation9 + $0xe8] sm:$0xff] %v754_v57  ;;  %v758_v62 = vadd.f32 %v757_v61, %v1414_v60 }
 0x251   :  { %870 = vst [vmem:[#allocation9 + $0xf0] sm:$0xff] %v756_v58 }
 0x252   :  { %871 = vst [vmem:[#allocation9 + $0xf8] sm:$0xff] %v758_v62 }
 0x254   :  { %v761_v55 = vpop.f32.mrb[32].mxu1 }
 0x255   :  { %v762_v63 = vadd.f32 %v761_v55, %v1412_v59  ;;  %v763_v0 = vpop.f32.mrb[33].mxu1 }
 0x256   :  { %v764_v1 = vadd.f32 %v763_v0, %v1414_v60  ;;  %v765_v3 = vpop.f32.mrb[34].mxu1 }
 0x257   :  { %872 = vst [vmem:[#allocation9 + $0x100] sm:$0xff] %v762_v63  ;;  %v766_v4 = vadd.f32 %v765_v3, %v1412_v59  ;;  %v767_v5 = vpop.f32.mrb[35].mxu1 }
 0x258   :  { %873 = vst [vmem:[#allocation9 + $0x108] sm:$0xff] %v764_v1  ;;  %v768_v6 = vadd.f32 %v767_v5, %v1414_v60 }
 0x259   :  { %874 = vst [vmem:[#allocation9 + $0x110] sm:$0xff] %v766_v4 }
 0x25a   :  { %875 = vst [vmem:[#allocation9 + $0x118] sm:$0xff] %v768_v6 }
 0x25c   :  { %v771_v7 = vpop.f32.mrb[36].mxu1 }
 0x25d   :  { %v772_v8 = vadd.f32 %v771_v7, %v1412_v59  ;;  %v773_v9 = vpop.f32.mrb[37].mxu1 }
 0x25e   :  { %v774_v10 = vadd.f32 %v773_v9, %v1414_v60  ;;  %v775_v11 = vpop.f32.mrb[38].mxu1 }
 0x25f   :  { %876 = vst [vmem:[#allocation9 + $0x120] sm:$0xff] %v772_v8  ;;  %v776_v12 = vadd.f32 %v775_v11, %v1412_v59  ;;  %v777_v13 = vpop.f32.mrb[39].mxu1 }
 0x260   :  { %877 = vst [vmem:[#allocation9 + $0x128] sm:$0xff] %v774_v10  ;;  %v778_v14 = vadd.f32 %v777_v13, %v1414_v60 }
 0x261   :  { %878 = vst [vmem:[#allocation9 + $0x130] sm:$0xff] %v776_v12 }
 0x262   :  { %879 = vst [vmem:[#allocation9 + $0x138] sm:$0xff] %v778_v14 }
 0x264   :  { %v781_v15 = vpop.f32.mrb[40].mxu1 }
 0x265   :  { %v782_v16 = vadd.f32 %v781_v15, %v1412_v59  ;;  %v783_v17 = vpop.f32.mrb[41].mxu1 }
 0x266   :  { %v784_v18 = vadd.f32 %v783_v17, %v1414_v60  ;;  %v785_v19 = vpop.f32.mrb[42].mxu1 }
 0x267   :  { %880 = vst [vmem:[#allocation9 + $0x140] sm:$0xff] %v782_v16  ;;  %v786_v20 = vadd.f32 %v785_v19, %v1412_v59  ;;  %v787_v21 = vpop.f32.mrb[43].mxu1 }
 0x268   :  { %881 = vst [vmem:[#allocation9 + $0x148] sm:$0xff] %v784_v18  ;;  %v788_v22 = vadd.f32 %v787_v21, %v1414_v60 }
 0x269   :  { %882 = vst [vmem:[#allocation9 + $0x150] sm:$0xff] %v786_v20 }
 0x26a   :  { %883 = vst [vmem:[#allocation9 + $0x158] sm:$0xff] %v788_v22 }
 0x26c   :  { %v791_v23 = vpop.f32.mrb[44].mxu1 }
 0x26d   :  { %v792_v24 = vadd.f32 %v791_v23, %v1412_v59  ;;  %v793_v25 = vpop.f32.mrb[45].mxu1 }
 0x26e   :  { %v794_v26 = vadd.f32 %v793_v25, %v1414_v60  ;;  %v795_v27 = vpop.f32.mrb[46].mxu1 }
 0x26f   :  { %884 = vst [vmem:[#allocation9 + $0x160] sm:$0xff] %v792_v24  ;;  %v796_v28 = vadd.f32 %v795_v27, %v1412_v59  ;;  %v797_v29 = vpop.f32.mrb[47].mxu1 }
 0x270   :  { %885 = vst [vmem:[#allocation9 + $0x168] sm:$0xff] %v794_v26  ;;  %v798_v30 = vadd.f32 %v797_v29, %v1414_v60 }
 0x271   :  { %886 = vst [vmem:[#allocation9 + $0x170] sm:$0xff] %v796_v28 }
 0x272   :  { %887 = vst [vmem:[#allocation9 + $0x178] sm:$0xff] %v798_v30 }
 0x274   :  { %v801_v31 = vpop.f32.mrb[48].mxu1 }
 0x275   :  { %v802_v32 = vadd.f32 %v801_v31, %v1412_v59  ;;  %v803_v33 = vpop.f32.mrb[49].mxu1 }
 0x276   :  { %v804_v34 = vadd.f32 %v803_v33, %v1414_v60  ;;  %v805_v35 = vpop.f32.mrb[50].mxu1 }
 0x277   :  { %888 = vst [vmem:[#allocation9 + $0x180] sm:$0xff] %v802_v32  ;;  %v806_v36 = vadd.f32 %v805_v35, %v1412_v59  ;;  %v807_v37 = vpop.f32.mrb[51].mxu1 }
 0x278   :  { %889 = vst [vmem:[#allocation9 + $0x188] sm:$0xff] %v804_v34  ;;  %v808_v38 = vadd.f32 %v807_v37, %v1414_v60 }
 0x279   :  { %890 = vst [vmem:[#allocation9 + $0x190] sm:$0xff] %v806_v36 }
 0x27a   :  { %891 = vst [vmem:[#allocation9 + $0x198] sm:$0xff] %v808_v38 }
 0x27c   :  { %v811_v39 = vpop.f32.mrb[52].mxu1 }
 0x27d   :  { %v812_v40 = vadd.f32 %v811_v39, %v1412_v59  ;;  %v813_v41 = vpop.f32.mrb[53].mxu1 }
 0x27e   :  { %v814_v42 = vadd.f32 %v813_v41, %v1414_v60  ;;  %v815_v43 = vpop.f32.mrb[54].mxu1 }
 0x27f   :  { %892 = vst [vmem:[#allocation9 + $0x1a0] sm:$0xff] %v812_v40  ;;  %v816_v44 = vadd.f32 %v815_v43, %v1412_v59  ;;  %v817_v45 = vpop.f32.mrb[55].mxu1 }
 0x280   :  { %893 = vst [vmem:[#allocation9 + $0x1a8] sm:$0xff] %v814_v42  ;;  %v818_v46 = vadd.f32 %v817_v45, %v1414_v60 }
 0x281   :  { %894 = vst [vmem:[#allocation9 + $0x1b0] sm:$0xff] %v816_v44 }
 0x282   :  { %895 = vst [vmem:[#allocation9 + $0x1b8] sm:$0xff] %v818_v46 }
 0x284   :  { %v821_v47 = vpop.f32.mrb[56].mxu1 }
 0x285   :  { %v822_v48 = vadd.f32 %v821_v47, %v1412_v59  ;;  %v823_v49 = vpop.f32.mrb[57].mxu1 }
 0x286   :  { %v824_v50 = vadd.f32 %v823_v49, %v1414_v60  ;;  %v825_v51 = vpop.f32.mrb[58].mxu1 }
 0x287   :  { %896 = vst [vmem:[#allocation9 + $0x1c0] sm:$0xff] %v822_v48  ;;  %v826_v52 = vadd.f32 %v825_v51, %v1412_v59  ;;  %v827_v53 = vpop.f32.mrb[59].mxu1 }
 0x288   :  { %897 = vst [vmem:[#allocation9 + $0x1c8] sm:$0xff] %v824_v50  ;;  %v828_v54 = vadd.f32 %v827_v53, %v1414_v60 }
 0x289   :  { %898 = vst [vmem:[#allocation9 + $0x1d0] sm:$0xff] %v826_v52 }
 0x28a   :  { %899 = vst [vmem:[#allocation9 + $0x1d8] sm:$0xff] %v828_v54 }
 0x28c   :  { %v831_v56 = vpop.f32.mrb[60].mxu1 }
 0x28d   :  { %v832_v57 = vadd.f32 %v831_v56, %v1412_v59  ;;  %v833_v2 = vpop.f32.mrb[61].mxu1 }
 0x28e   :  { %v834_v58 = vadd.f32 %v833_v2, %v1414_v60  ;;  %v835_v61 = vpop.f32.mrb[62].mxu1 }
 0x28f   :  { %900 = vst [vmem:[#allocation9 + $0x1e0] sm:$0xff] %v832_v57  ;;  %v836_v62 = vadd.f32 %v835_v61, %v1412_v59  ;;  %v837_v55 = vpop.f32.mrb[63].mxu1 }
 0x290   :  { %901 = vst [vmem:[#allocation9 + $0x1e8] sm:$0xff] %v834_v58  ;;  %v838_v63 = vadd.f32 %v837_v55, %v1414_v60 }
 0x291   :  { %902 = vst [vmem:[#allocation9 + $0x1f0] sm:$0xff] %v836_v62 }
 0x292   :  { %903 = vst [vmem:[#allocation9 + $0x1f8] sm:$0xff] %v838_v63 }
 0x293   :  { %1259 = shalt.err (!%p1256_p0)
}
 0x294   :  { %s1260_s14 = scalar_lea.hbm %s1500_s5, 8192 }
 0x295   :  { %p1261_p1 = scmp.ne.s32.totalorder %s1500_s5, %s1260_s14  ;;  %p1264_p2 = scmp.lt.u32.totalorder %s1260_s14, %s1500_s5 }
 0x297   :  { %p1266_p3 = pnand %p1264_p2, %p1261_p1 }
 0x299   :  { %1269 = shalt.err (!%p1266_p3)
}
 0x29a   :  { %915 = dma.vmem_to_hbm [thread:$0]  %s910_s10, 8192, %s1500_s5, [#allocation5], %s1280_s1, %s1280_s1, %s1281_s17  }
 0x29b   :  { %1274 = dma.done.wait [#allocation5], 8192  }
 0x29c   :  { %1275 = vsyncadd [#allocation5], 4294959104 }
 0x29d   :  { %919 = vsyncpa [#allocation4], 1 }
 0x29e   :  { %920 = vsyncpa [#allocation7], 1 }
 0x29f   :  { %921 = vsyncpa [#allocation5], 1 }

</bundles_post_ra>
